<compile_context>
chip_gen: v6e
topology: v6e:2x2x1
jax: 0.10.0
libtpu: 0.0.40
codegen_flags: <defaults>
</compile_context>

<pallas_src>
import functools

import jax
import jax.numpy as jnp
from jax.experimental import pallas as pl
from jax.experimental.pallas import tpu as pltpu

_LANE = 128


def _round_up(n: int, m: int) -> int:
    return ((n + m - 1) // m) * m


def _cdiv(a: int, b: int) -> int:
    return (a + b - 1) // b


@functools.lru_cache(maxsize=1)
def _vmem_capacity_bytes() -> int:
    """Generation-aware VMEM capacity; falls back to the v7x worst case (64 MiB)."""
    try:
        cap = int(getattr(pltpu.get_tpu_info(), "vmem_capacity_bytes", 0))
        if cap > 0:
            return cap
    except Exception:
        pass
    return 64 * 1024 * 1024


# ---------------------------------------------------------------------------
# Kernels
# ---------------------------------------------------------------------------
def _mlp_resident_kernel(x_ref, w1_ref, b1_ref, w2_ref, b2_ref, o_ref):
    """Both weight matrices VMEM-resident; grid = batch tiles only."""
    # Layer 1: MXU matmul with f32 accumulation; bias + tanh in f32 (VPU/EUP).
    h = jnp.dot(x_ref[...], w1_ref[...], preferred_element_type=jnp.float32)
    h = jnp.tanh(h + b1_ref[...])
    # Layer 2: MXU matmul with f32 accumulation.
    o = jnp.dot(h.astype(w2_ref.dtype), w2_ref[...],
                preferred_element_type=jnp.float32)
    o_ref[...] = (o + b2_ref[...]).astype(o_ref.dtype)


def _mlp_hid_tiled_kernel(x_ref, w1_ref, b1_ref, w2_ref, b2_ref, o_ref, acc_ref):
    """Hidden dim tiled as a reduction axis (grid = (batch tiles, hid tiles))."""
    j = pl.program_id(1)

    @pl.when(j == 0)
    def _():
        acc_ref[...] = jnp.zeros_like(acc_ref)

    h = jnp.dot(x_ref[...], w1_ref[...], preferred_element_type=jnp.float32)
    h = jnp.tanh(h + b1_ref[...])          # tanh is per-hidden-column -> tiling is exact
    acc_ref[...] += jnp.dot(h.astype(w2_ref.dtype), w2_ref[...],
                            preferred_element_type=jnp.float32)

    @pl.when(j == pl.num_programs(1) - 1)
    def _():
        o_ref[...] = (acc_ref[...] + b2_ref[...]).astype(o_ref.dtype)


# ---------------------------------------------------------------------------
# VMEM sizing helpers
# ---------------------------------------------------------------------------
def _resident_vmem_bytes(tb, in_f, hid_p, out_p, itemsize):
    weights = (in_f * hid_p + hid_p + hid_p * out_p + out_p) * itemsize  # Buffered(1)
    acts = 2 * tb * (in_f + out_p) * itemsize                            # x / out double-buffered
    interm = tb * (hid_p + out_p) * 4                                    # f32 intermediates
    return weights + acts + interm


def _hid_tiled_vmem_bytes(tb, th, in_f, out_p, itemsize):
    weights = 2 * (in_f * th + th + th * out_p) * itemsize + out_p * itemsize
    acts = 2 * tb * (in_f + out_p) * itemsize
    interm = tb * (th + out_p) * 4 + tb * out_p * 4                      # f32 h, o, acc scratch
    return weights + acts + interm


def _pick_resident_tb(in_f, hid_p, out_p, itemsize, budget, row_align):
    for tb in (2048, 1024, 512, 256, 128, 64, 32, 16, 8):
        if tb % row_align:
            continue
        if _resident_vmem_bytes(tb, in_f, hid_p, out_p, itemsize) <= budget:
            return tb
    return row_align


def _pick_hid_tiles(b, in_f, hid_p, out_p, itemsize, budget, row_align):
    # Cap TH at HID_P // 2 when possible so the reduction axis has >= 2 steps;
    # in the regimes where this path is actually needed HID_P is large anyway.
    th_cap = hid_p // 2 if hid_p >= 2 * _LANE else hid_p
    th_cap = max(th_cap, _LANE)
    b_eff = _round_up(max(b, 1), row_align)
    best = None
    for th in (1024, 512, 256, 128):
        if th > th_cap or hid_p % th != 0:
            continue
        for tb in (1024, 512, 256, 128, 64, 32, 16, 8):
            if tb % row_align:
                continue
            if _hid_tiled_vmem_bytes(tb, th, in_f, out_p, itemsize) <= budget:
                score = (min(tb, b_eff), th)      # prefer useful batch tile, then bigger TH
                if best is None or score > best[0]:
                    best = (score, tb, th)
                break
    if best is not None:
        return best[1], best[2]
    return row_align, _LANE                       # last resort: smallest tiles


def _clamp_batch_tile(tb, b, row_align):
    """Never pad the batch beyond what one tile needs; prefer >=2 tiles (v7x megacore)."""
    tb = min(tb, _round_up(max(b, 1), row_align))
    if b >= 2 * row_align and _cdiv(b, tb) < 2:
        tb = _round_up(_cdiv(b, 2), row_align)
    return tb


# ---------------------------------------------------------------------------
# Wrapper
# ---------------------------------------------------------------------------
def pad_params(w1, b1, w2, b2):
    """Zero-pad hidden/output lane dims to multiples of 128 ONCE at init.

    Zero columns/rows/biases are mathematically inert (tanh(0)=0 and zero
    weights contribute nothing), so results on the real slice are unchanged.
    """
    in_f, hid = w1.shape
    out = w2.shape[1]
    hid_p = _round_up(hid, _LANE)
    out_p = _round_up(out, _LANE)
    w1p = jnp.pad(w1, ((0, 0), (0, hid_p - hid)))
    b1p = jnp.pad(jnp.reshape(b1, (1, hid)), ((0, 0), (0, hid_p - hid)))
    w2p = jnp.pad(w2, ((0, hid_p - hid), (0, out_p - out)))
    b2p = jnp.pad(jnp.reshape(b2, (1, out)), ((0, 0), (0, out_p - out)))
    return w1p, b1p, w2p, b2p


@functools.partial(jax.jit, static_argnames=("out_features", "mode"))
def simple_nn_forward(x, w1p, b1p, w2p, b2p, *, out_features, mode="auto"):
    """Fused forward of SimpleNN: tanh(x @ W1 + b1) @ W2 + b2.

    x: (B, in); padded params from pad_params(); `out_features` = real output size.
    mode: "auto" | "resident" | "hid_tiled".
    """
    B, IN = x.shape
    assert w1p.shape[0] == IN
    HID_P = w1p.shape[1]
    OUT_P = w2p.shape[1]
    itemsize = jnp.dtype(x.dtype).itemsize

    cap = _vmem_capacity_bytes()
    budget = int(cap * 0.70)                       # headroom for compiler scratch
    row_align = 8 if itemsize >= 4 else 16         # (8,128) f32 / (16,128) bf16 tiles

    weight_bytes = (IN * HID_P + HID_P + HID_P * OUT_P + OUT_P) * itemsize
    if mode == "auto":
        use_resident = weight_bytes <= budget // 2
    else:
        use_resident = (mode == "resident")

    # TODO(synk): tile IN as an additional reduction axis for very large input_size.

    if use_resident:
        TB = _pick_resident_tb(IN, HID_P, OUT_P, itemsize, budget, row_align)
        TB = _clamp_batch_tile(TB, B, row_align)
        B_P = _round_up(B, TB)
        xp = x if B_P == B else jnp.pad(x, ((0, B_P - B), (0, 0)))
        est = _resident_vmem_bytes(TB, IN, HID_P, OUT_P, itemsize)
        vmem_limit = min(int(cap * 0.9), max(32 * 1024 * 1024, int(1.5 * est)))

        cost = pl.CostEstimate(
            flops=2 * B_P * (IN * HID_P + HID_P * OUT_P),
            transcendentals=B_P * HID_P,
            bytes_accessed=(xp.size + w1p.size + b1p.size + w2p.size + b2p.size
                            + B_P * OUT_P) * itemsize,
        )
        resident = pl.Buffered(1)   # grid-invariant operands: single VMEM buffer

        out_pad = pl.pallas_call(
            _mlp_resident_kernel,
            out_shape=jax.ShapeDtypeStruct((B_P, OUT_P), x.dtype),
            grid=(B_P // TB,),
            in_specs=[
                # x tiles stream over the batch axis; feature dim left unpadded
                # (block dim == full array dim is legal) to cut HBM read traffic.
                pl.BlockSpec((TB, IN), lambda i: (i, 0)),
                pl.BlockSpec((IN, HID_P), lambda i: (0, 0), pipeline_mode=resident),
                pl.BlockSpec((1, HID_P), lambda i: (0, 0), pipeline_mode=resident),
                pl.BlockSpec((HID_P, OUT_P), lambda i: (0, 0), pipeline_mode=resident),
                pl.BlockSpec((1, OUT_P), lambda i: (0, 0), pipeline_mode=resident),
            ],
            out_specs=pl.BlockSpec((TB, OUT_P), lambda i: (i, 0)),
            compiler_params=pltpu.CompilerParams(
                dimension_semantics=("parallel",),   # v7x: shard batch tiles over 2 TCs
                vmem_limit_bytes=vmem_limit,
            ),
            cost_estimate=cost,
        )(xp, w1p, b1p, w2p, b2p)
    else:
        TB, TH = _pick_hid_tiles(B, IN, HID_P, OUT_P, itemsize, budget, row_align)
        TB = _clamp_batch_tile(TB, B, row_align)
        B_P = _round_up(B, TB)
        xp = x if B_P == B else jnp.pad(x, ((0, B_P - B), (0, 0)))
        n_hid = HID_P // TH
        est = _hid_tiled_vmem_bytes(TB, TH, IN, OUT_P, itemsize)
        vmem_limit = min(int(cap * 0.9), max(32 * 1024 * 1024, int(1.5 * est)))

        cost = pl.CostEstimate(
            flops=2 * B_P * (IN * HID_P + HID_P * OUT_P),
            transcendentals=B_P * HID_P,
            bytes_accessed=(xp.size
                            + (B_P // TB) * (w1p.size + b1p.size + w2p.size)
                            + b2p.size + B_P * OUT_P) * itemsize,
        )

        out_pad = pl.pallas_call(
            _mlp_hid_tiled_kernel,
            out_shape=jax.ShapeDtypeStruct((B_P, OUT_P), x.dtype),
            grid=(B_P // TB, n_hid),
            in_specs=[
                # x block index is constant over the hid axis -> fetched once per batch tile.
                pl.BlockSpec((TB, IN), lambda i, j: (i, 0)),
                pl.BlockSpec((IN, TH), lambda i, j: (0, j)),
                pl.BlockSpec((1, TH), lambda i, j: (0, j)),
                pl.BlockSpec((TH, OUT_P), lambda i, j: (j, 0)),
                pl.BlockSpec((1, OUT_P), lambda i, j: (0, 0),
                             pipeline_mode=pl.Buffered(1)),
            ],
            out_specs=pl.BlockSpec((TB, OUT_P), lambda i, j: (i, 0)),
            scratch_shapes=[pltpu.VMEM((TB, OUT_P), jnp.float32)],
            compiler_params=pltpu.CompilerParams(
                dimension_semantics=("parallel", "arbitrary"),
                vmem_limit_bytes=vmem_limit,
            ),
            cost_estimate=cost,
        )(xp, w1p, b1p, w2p, b2p)

    return out_pad[:B, :out_features]


def init_params(key, input_size, hidden_size, output_size, dtype=jnp.float32):
    """Deterministic init mimicking PyTorch nn.Linear (uniform +/- 1/sqrt(fan_in)),
    with weights stored as (in, out)."""
    k1, k2, k3, k4 = jax.random.split(key, 4)
    bound1 = 1.0 / (input_size ** 0.5)
    bound2 = 1.0 / (hidden_size ** 0.5)
    w1 = jax.random.uniform(k1, (input_size, hidden_size), dtype, -bound1, bound1)
    b1 = jax.random.uniform(k2, (1, hidden_size), dtype, -bound1, bound1)
    w2 = jax.random.uniform(k3, (hidden_size, output_size), dtype, -bound2, bound2)
    b2 = jax.random.uniform(k4, (1, output_size), dtype, -bound2, bound2)
    return w1, b1, w2, b2


if __name__ == "__main__":
    # Small shapes consistent with the module: batch=8, input=32, hidden=64, output=16.
    batch, input_size, hidden_size, output_size = 8, 32, 64, 16

    key = jax.random.PRNGKey(0)
    kx, kp = jax.random.split(key)
    x = jax.random.normal(kx, (batch, input_size), jnp.float32)
    w1, b1, w2, b2 = init_params(kp, input_size, hidden_size, output_size)
    w1p, b1p, w2p, b2p = pad_params(w1, b1, w2, b2)

    out = simple_nn_forward(x, w1p, b1p, w2p, b2p, out_features=output_size)
    out = jax.block_until_ready(out)

    ref = jnp.tanh(x @ w1 + b1) @ w2 + b2
    assert out.shape == (batch, output_size)
    assert jnp.allclose(out, ref, atol=1e-5, rtol=1e-5)

    # Also exercise the hidden-tiled fallback (used for large layers on v7x's
    # 64 MiB VMEM) at small shapes: 2 batch tiles x 2 hidden (reduction) tiles.
    bsz2, in2, hid2, out2 = 24, 32, 256, 16
    k1, k2 = jax.random.split(jax.random.PRNGKey(1))
    x2 = jax.random.normal(k1, (bsz2, in2), jnp.float32)
    p2 = init_params(k2, in2, hid2, out2)
    p2p = pad_params(*p2)
    got2 = simple_nn_forward(x2, *p2p, out_features=out2, mode="hid_tiled")
    got2 = jax.block_until_ready(got2)
    ref2 = jnp.tanh(x2 @ p2[0] + p2[1]) @ p2[2] + p2[3]
    assert got2.shape == (bsz2, out2)
    assert jnp.allclose(got2, ref2, atol=1e-4, rtol=1e-4)

    print("KERNEL_OK")
</pallas_src>

<mosaic_0001>
module attributes {stable_mosaic.version = 11 : i64} {
  func.func @_mlp_resident_kernel(%arg0: i32, %arg1: memref<8x32xf32, #tpu.memory_space<vmem>>, %arg2: memref<32x128xf32, #tpu.memory_space<vmem>>, %arg3: memref<1x128xf32, #tpu.memory_space<vmem>>, %arg4: memref<128x128xf32, #tpu.memory_space<vmem>>, %arg5: memref<1x128xf32, #tpu.memory_space<vmem>>, %arg6: memref<8x128xf32, #tpu.memory_space<vmem>>) attributes {dimension_semantics = [#tpu.dimension_semantics<parallel>], iteration_bounds = array<i64: 1>, scalar_prefetch = 0 : i64, scratch_operands = 0 : i64, tpu.core_type = #tpu.core_type<tc>, window_params = [{transform_indices = @transform_0, window_bounds = array<i64: 8, 32>}, {pipeline_mode = #tpu.pipeline_mode<synchronous>, transform_indices = @transform_1, window_bounds = array<i64: 32, 128>}, {pipeline_mode = #tpu.pipeline_mode<synchronous>, transform_indices = @transform_2, window_bounds = array<i64: 1, 128>}, {pipeline_mode = #tpu.pipeline_mode<synchronous>, transform_indices = @transform_3, window_bounds = array<i64: 128, 128>}, {pipeline_mode = #tpu.pipeline_mode<synchronous>, transform_indices = @transform_4, window_bounds = array<i64: 1, 128>}, {transform_indices = @transform_5, window_bounds = array<i64: 8, 128>}]} {
    %c0 = arith.constant 0 : index
    %c0_0 = arith.constant 0 : index
    %0 = vector.load %arg1[%c0, %c0_0] : memref<8x32xf32, #tpu.memory_space<vmem>>, vector<8x32xf32>
    %c0_1 = arith.constant 0 : index
    %c0_2 = arith.constant 0 : index
    %1 = vector.load %arg2[%c0_1, %c0_2] : memref<32x128xf32, #tpu.memory_space<vmem>>, vector<32x128xf32>
    %cst = arith.constant dense<0.000000e+00> : vector<8x128xf32>
    %2 = tpu.matmul %0, %1, %cst {dimension_numbers = #tpu.dot_dimension_numbers<[1], [0], [0], [1], [0, 0, 1, 1], [], []>} : vector<8x32xf32>, vector<32x128xf32>, vector<8x128xf32> -> vector<8x128xf32>
    %c0_3 = arith.constant 0 : index
    %c0_4 = arith.constant 0 : index
    %3 = vector.load %arg3[%c0_3, %c0_4] : memref<1x128xf32, #tpu.memory_space<vmem>>, vector<1x128xf32>
    %4 = vector.broadcast %3 : vector<1x128xf32> to vector<8x128xf32>
    %5 = arith.addf %2, %4 : vector<8x128xf32>
    %6 = math.tanh %5 : vector<8x128xf32>
    %c0_5 = arith.constant 0 : index
    %c0_6 = arith.constant 0 : index
    %7 = vector.load %arg4[%c0_5, %c0_6] : memref<128x128xf32, #tpu.memory_space<vmem>>, vector<128x128xf32>
    %cst_7 = arith.constant dense<0.000000e+00> : vector<8x128xf32>
    %8 = tpu.matmul %6, %7, %cst_7 {dimension_numbers = #tpu.dot_dimension_numbers<[1], [0], [0], [1], [0, 0, 1, 1], [], []>} : vector<8x128xf32>, vector<128x128xf32>, vector<8x128xf32> -> vector<8x128xf32>
    %c0_8 = arith.constant 0 : index
    %c0_9 = arith.constant 0 : index
    %9 = vector.load %arg5[%c0_8, %c0_9] : memref<1x128xf32, #tpu.memory_space<vmem>>, vector<1x128xf32>
    %10 = vector.broadcast %9 : vector<1x128xf32> to vector<8x128xf32>
    %11 = arith.addf %8, %10 : vector<8x128xf32>
    %c0_10 = arith.constant 0 : index
    %c0_11 = arith.constant 0 : index
    %12 = vector.load %arg6[%c0_10, %c0_11] : memref<8x128xf32, #tpu.memory_space<vmem>>, vector<8x128xf32>
    tpu.vector_store %arg6[%c0_10, %c0_11], %11 {strides = array<i32>} : memref<8x128xf32, #tpu.memory_space<vmem>>, vector<8x128xf32>,
    return
  }
  func.func @transform_0(%arg0: i32) -> (i32, i32) {
    %c0_i32 = arith.constant 0 : i32
    %c0_i32_0 = arith.constant 0 : i32
    return %arg0, %c0_i32 : i32, i32
  }
  func.func @transform_1(%arg0: i32) -> (i32, i32) {
    %c0_i32 = arith.constant 0 : i32
    %c0_i32_0 = arith.constant 0 : i32
    %c0_i32_1 = arith.constant 0 : i32
    return %c0_i32, %c0_i32_0 : i32, i32
  }
  func.func @transform_2(%arg0: i32) -> (i32, i32) {
    %c0_i32 = arith.constant 0 : i32
    %c0_i32_0 = arith.constant 0 : i32
    %c0_i32_1 = arith.constant 0 : i32
    return %c0_i32, %c0_i32_0 : i32, i32
  }
  func.func @transform_3(%arg0: i32) -> (i32, i32) {
    %c0_i32 = arith.constant 0 : i32
    %c0_i32_0 = arith.constant 0 : i32
    %c0_i32_1 = arith.constant 0 : i32
    return %c0_i32, %c0_i32_0 : i32, i32
  }
  func.func @transform_4(%arg0: i32) -> (i32, i32) {
    %c0_i32 = arith.constant 0 : i32
    %c0_i32_0 = arith.constant 0 : i32
    %c0_i32_1 = arith.constant 0 : i32
    return %c0_i32, %c0_i32_0 : i32, i32
  }
  func.func @transform_5(%arg0: i32) -> (i32, i32) {
    %c0_i32 = arith.constant 0 : i32
    %c0_i32_0 = arith.constant 0 : i32
    return %arg0, %c0_i32 : i32, i32
  }
}

</mosaic_0001>

<bundles_post_ra>
// kernel: simple_nn_forward.1
= control target key start
LH: loop header
LB: loop body
LE: loop exit
PB: predicated region body
PF: predicated region fallthrough
CT: control target
= control target key end

     0   :  { %10 = vsyncpa [#allocation3], 0  ;;  %s502_s0 = inlined_call_operand.hbm [shape: f32[8,32], index: 0, kind: input, shape index: {}]   ;;  %s503_s1 = inlined_call_operand.hbm [shape: f32[32,128], index: 1, kind: input, shape index: {}]   ;;  %s504_s2 = inlined_call_operand.vmem [shape: f32[1,128], index: 2, kind: input, shape index: {}]   ;;  %s505_s3 = inlined_call_operand.hbm [shape: f32[128,128], index: 3, kind: input, shape index: {}]   ;;  %s506_s4 = inlined_call_operand.vmem [shape: f32[1,128], index: 4, kind: input, shape index: {}]   ;;  %s507_s5 = inlined_call_operand.hbm [shape: f32[8,128], index: 5, kind: output, shape index: {}]  }
   0x1   :  { %11 = vsyncpa [#allocation6], 0 }
   0x2   :  { %12 = vsyncpa [#allocation4], 0  ;;  %s424_s18 = smov [#allocation5]  }
   0x3   :  { %s28_s19 = sshll.u32 %s424_s18, 4  ;;  %s29_s19 = int_to_ptr.vmem [resolvable:$true] %s28_s19 }
   0x4   :  { %s346_s20 = scalar_lea.vmem %s29_s19, 512  ;;  %p351_p1 = scmp.lt.s32.totalorder %s29_s19, %s29_s19 }
   0x5   :  { %p347_p0 = scmp.ne.s32.totalorder %s29_s19, %s346_s20  ;;  %p352_p2 = scmp.lt.s32.totalorder %s346_s20, %s346_s20 }
   0x7   :  { %p353_p3 = por %p352_p2, %p351_p1 }
   0x9   :  { %p354_p4 = pnand %p353_p3, %p347_p0 }
   0xb   :  { %357 = shalt.err (!%p354_p4)
}
   0xc   :  { %s425_s21 = smov 128   ;;  %s426_s22 = smov 8  }
   0xd   :  { %34 = dma.hbm_to_vmem [thread:$0]  %s503_s1, 512, %s29_s19, [#allocation6], %s425_s21, %s425_s21, %s426_s22  }
   0xe   :  { %s427_s25 = smov [#allocation2]   ;;  %s428_s27 = smov [#allocation7]  }
   0xf   :  { %s19_s26 = sshll.u32 %s427_s25, 4  ;;  %s42_s28 = sshll.u32 %s428_s27, 4  ;;  %s20_s26 = int_to_ptr.vmem [resolvable:$true] %s19_s26  ;;  %s43_s28 = int_to_ptr.vmem [resolvable:$true] %s42_s28 }
  0x10   :  { %s366_s29 = scalar_lea.vmem %s20_s26, 128  ;;  %p371_p6 = scmp.lt.s32.totalorder %s20_s26, %s20_s26 }
  0x11   :  { %p367_p5 = scmp.ne.s32.totalorder %s20_s26, %s366_s29  ;;  %p372_p7 = scmp.lt.s32.totalorder %s366_s29, %s366_s29 }
  0x13   :  { %p373_p8 = por %p372_p7, %p371_p6 }
  0x15   :  { %p374_p9 = pnand %p373_p8, %p367_p5 }
  0x17   :  { %377 = shalt.err (!%p374_p9)
}
  0x18   :  { %22 = dma.hbm_to_vmem [thread:$0]  %s502_s0, 128, %s20_s26, [#allocation3]  }
  0x19   :  { %s386_s7 = scalar_lea.vmem %s43_s28, 2048  ;;  %p391_p11 = scmp.lt.s32.totalorder %s43_s28, %s43_s28 }
  0x1a   :  { %p387_p10 = scmp.ne.s32.totalorder %s43_s28, %s386_s7  ;;  %p392_p12 = scmp.lt.s32.totalorder %s386_s7, %s386_s7 }
  0x1c   :  { %p393_p13 = por %p392_p12, %p391_p11 }
  0x1e   :  { %p394_p0 = pnand %p393_p13, %p387_p10 }
  0x20   :  { %397 = shalt.err (!%p394_p0)
}
  0x21   :  { %48 = dma.hbm_to_vmem [thread:$0]  %s505_s3, 2048, %s43_s28, [#allocation6], %s425_s21, %s425_s21, %s426_s22  }
  0x22   :  { %418 = dma.done.wait [#allocation3], 128  }
  0x23   :  { %419 = vsyncadd [#allocation3], 4294967168 }
  0x24   :  { %420 = dma.done.wait [#allocation6], 2560  }
  0x25   :  { %421 = vsyncadd [#allocation6], 4294964736  ;;  %v429_v0 = vmov 0.0   ;;  %vm430_vm0 = vmmov 0   ;;  %v64_v1 = vld [vmem:[#allocation5 + $0x18] sm:$0xff]  ;;  %v63_v2 = vld [vmem:[#allocation5 + $0x10] sm:$0xff] }
  0x26   :  { %282 = vmatprep.subr.mxu0 %v429_v0  ;;  %290 = vmatprep.mubr.msk.f32.mxu0 %vm430_vm0, %v429_v0  ;;  %v162_v3 = vld [vmem:[#allocation7 + $0x78] sm:$0xff]  ;;  %v62_v4 = vld [vmem:[#allocation5 + $0x8] sm:$0xff]  ;;  %v161_v5 = vld [vmem:[#allocation7 + $0x70] sm:$0xff]  ;;  %vm72_vm1 = vcmask 261120   ;;  %s431_s11 = smov [#allocation8]  }
  0x27   :  { %293 = vmatprep.subr.mxu1 %v429_v0  ;;  %325 = vmatprep.mubr.msk.f32.mxu1 %vm430_vm0, %v429_v0  ;;  %v160_v6 = vld [vmem:[#allocation7 + $0x68] sm:$0xff]  ;;  %v61_v7 = vld [vmem:[#allocation5] sm:$0xff]  ;;  %v60_v8 = vld [vmem:[#allocation2] sm:$0xff]  ;;  %s247_s12 = sshll.u32 %s431_s11, 4  ;;  %s248_s12 = int_to_ptr.vmem [resolvable:$true] %s247_s12 }
  0x28   :  { %283 = vmatpush3.msra.mxu0 %v64_v1  ;;  %294 = vmatpush3.msra.mxu1 %v162_v3  ;;  %v159_v9 = vld [vmem:[#allocation7 + $0x60] sm:$0xff]  ;;  %v158_v10 = vld [vmem:[#allocation7 + $0x58] sm:$0xff]  ;;  %v157_v11 = vld [vmem:[#allocation7 + $0x50] sm:$0xff]  ;;  %s398_s13 = scalar_lea.vmem %s248_s12, 128  ;;  %p403_p2 = scmp.lt.s32.totalorder %s248_s12, %s248_s12 }
  0x29   :  { %284 = vmatprep.subr.mxu0 %v429_v0  ;;  %295 = vmatprep.subr.mxu1 %v429_v0  ;;  %v156_v12 = vld [vmem:[#allocation7 + $0x48] sm:$0xff]  ;;  %v155_v13 = vld [vmem:[#allocation7 + $0x40] sm:$0xff]  ;;  %v154_v14 = vld [vmem:[#allocation7 + $0x38] sm:$0xff]  ;;  %p399_p1 = scmp.ne.s32.totalorder %s248_s12, %s398_s13  ;;  %p404_p3 = scmp.lt.s32.totalorder %s398_s13, %s398_s13 }
  0x2a   :  { %285 = vmatpush3.msra.mxu0 %v63_v2  ;;  %296 = vmatpush3.msra.mxu1 %v161_v5  ;;  %v153_v15 = vld [vmem:[#allocation7 + $0x30] sm:$0xff]  ;;  %v152_v16 = vld [vmem:[#allocation7 + $0x28] sm:$0xff]  ;;  %v151_v17 = vld [vmem:[#allocation7 + $0x20] sm:$0xff] }
  0x2b   :  { %286 = vmatprep.subr.mxu0 %v429_v0  ;;  %297 = vmatprep.subr.mxu1 %v429_v0  ;;  %v150_v18 = vld [vmem:[#allocation7 + $0x18] sm:$0xff]  ;;  %v149_v19 = vld [vmem:[#allocation7 + $0x10] sm:$0xff]  ;;  %v148_v20 = vld [vmem:[#allocation7 + $0x8] sm:$0xff]  ;;  %p405_p4 = por %p404_p3, %p403_p2 }
  0x2c   :  { %287 = vmatpush3.msra.mxu0 %v62_v4  ;;  %298 = vmatpush3.msra.mxu1 %v160_v6  ;;  %v147_v21 = vld [vmem:[#allocation7] sm:$0xff]  ;;  %v257_v22 = vld [vmem:[%s504_s2] ss:$0 sm:$0xff] }
  0x2d   :  { %288 = vmatprep.subr.mxu0 %v429_v0  ;;  %299 = vmatprep.subr.mxu1 %v429_v0  ;;  %v259_v27 = vld [vmem:[%s506_s4] ss:$0 sm:$0xff]  ;;  %p406_p5 = pnand %p405_p4, %p399_p1 }
  0x2e   :  { %289 = vmatpush3.msra.mxu0 %v61_v7  ;;  %300 = vmatpush3.msra.mxu1 %v159_v9 }
  0x2f   :  { %291 = vmatmul.mubr.msk.f32.vlgmr.msra.gmra.mxu0 %vm72_vm1, %v60_v8  ;;  %301 = vmatprep.subr.mxu1 %v429_v0 }
  0x30   :  { %302 = vmatpush3.msra.mxu1 %v158_v10 }
  0x31   :  { %303 = vmatprep.subr.mxu1 %v429_v0 }
  0x32   :  { %304 = vmatpush3.msra.mxu1 %v157_v11 }
  0x33   :  { %305 = vmatprep.subr.mxu1 %v429_v0 }
  0x34   :  { %306 = vmatpush3.msra.mxu1 %v156_v12 }
  0x35   :  { %307 = vmatprep.subr.mxu1 %v429_v0 }
  0x36   :  { %308 = vmatpush3.msra.mxu1 %v155_v13 }
  0x37   :  { %309 = vmatprep.subr.mxu1 %v429_v0 }
  0x38   :  { %310 = vmatpush3.msra.mxu1 %v154_v14 }
  0x39   :  { %311 = vmatprep.subr.mxu1 %v429_v0 }
  0x3a   :  { %312 = vmatpush3.msra.mxu1 %v153_v15 }
  0x3b   :  { %313 = vmatprep.subr.mxu1 %v429_v0 }
  0x3c   :  { %314 = vmatpush3.msra.mxu1 %v152_v16 }
  0x3d   :  { %315 = vmatprep.subr.mxu1 %v429_v0 }
  0x3e   :  { %316 = vmatpush3.msra.mxu1 %v151_v17 }
  0x3f   :  { %317 = vmatprep.subr.mxu1 %v429_v0 }
  0x40   :  { %318 = vmatpush3.msra.mxu1 %v150_v18 }
  0x41   :  { %319 = vmatprep.subr.mxu1 %v429_v0 }
  0x42   :  { %320 = vmatpush3.msra.mxu1 %v149_v19 }
  0x43   :  { %321 = vmatprep.subr.mxu1 %v429_v0 }
  0x44   :  { %322 = vmatpush3.msra.mxu1 %v148_v20 }
  0x45   :  { %323 = vmatprep.subr.mxu1 %v429_v0 }
  0x46   :  { %324 = vmatpush3.msra.mxu1 %v147_v21 }
  0xef   :  { %v142_v23 = vpop.f32.mrf.mxu0 }
  0xf0   :  { %v143_v24 = vadd.f32 %v257_v22, %v142_v23 }
  0xf1   :  { %v292_v25 = vpop.f32.mrf.mxu0 }
  0xf2   :  { %336 = vtanh.f32 %v143_v24 }
  0xff   :  { %v337_v26 = vpop.eup %336 }
 0x100   :  { %326 = vmatmul.mubr.f32.vlgmr.msra.gmra.mxu1 %v337_v26 }
 0x1c0   :  { %v236_v28 = vpop.f32.mrf.mxu1 }
 0x1c1   :  { %v237_v29 = vadd.f32 %v259_v27, %v236_v28 }
 0x1c2   :  { %v327_v30 = vpop.f32.mrf.mxu1 }
 0x1c3   :  { %240 = vst [vmem:[#allocation8] sm:$0xff] %v237_v29 }
 0x1c4   :  { %409 = shalt.err (!%p406_p5)
}
 0x1c5   :  { %250 = dma.vmem_to_hbm [thread:$0]  %s248_s12, 128, %s507_s5, [#allocation4]  }
 0x1c6   :  { %422 = dma.done.wait [#allocation4], 128  }
 0x1c7   :  { %423 = vsyncadd [#allocation4], 4294967168 }
 0x1c8   :  { %254 = vsyncpa [#allocation3], 1 }
 0x1c9   :  { %255 = vsyncpa [#allocation6], 1 }
 0x1ca   :  { %256 = vsyncpa [#allocation4], 1 }

</bundles_post_ra>
